<compile_context>
chip_gen: v7x
topology: tpu7x:2x2x1
jax: 0.10.0
libtpu: 0.0.40
codegen_flags: <defaults>
</compile_context>

<pallas_src>
import functools

import jax
import jax.numpy as jnp
from jax.experimental import pallas as pl
from jax.experimental.pallas import tpu as pltpu


# ---------------------------------------------------------------------------
# Kernel
# ---------------------------------------------------------------------------
def _bev_reduce_kernel(w_ref,     # VMEM (tm, tk)   : weight tile, torch (out, in) layout
                       x_ref,     # VMEM (1, tk, tn): input tile (spatial-k x channels)
                       b_ref,     # VMEM (tm, 1)    : bias column tile
                       o_ref,     # VMEM (1, tm, tn): output tile
                       acc_ref):  # VMEM (tm, tn) f32 accumulator scratch
    k = pl.program_id(3)

    @pl.when(k == 0)
    def _():
        acc_ref[...] = jnp.zeros_like(acc_ref)

    # (tm, tk) @ (tk, tn) on the MXU, f32 accumulate.  Channels (tn) stay on the
    # lane dimension -> lane-dense compute and stores.
    acc_ref[...] += jnp.dot(w_ref[...], x_ref[0],
                            preferred_element_type=jnp.float32)

    @pl.when(k == pl.num_programs(3) - 1)
    def _():
        # bias[n] broadcast along channels (lanes); single unmasked wide store.
        o_ref[0] = (acc_ref[...] + b_ref[...]).astype(o_ref.dtype)


# ---------------------------------------------------------------------------
# Wrapper
# ---------------------------------------------------------------------------
def bev_feature_reducer(x, w_t, bias, h_out, w_out, *, tm=None, tn=None, tk=None):
    """x: (B, H1, W1, C); w_t: (H2*W2, H1*W1) torch layout; bias: (H2*W2,)."""
    B, H1, W1, C = x.shape
    K = H1 * W1
    N_out = h_out * w_out
    assert w_t.shape == (N_out, K)
    assert bias.shape == (N_out,)

    # Free reshapes only (no permutes): the channel-last layout is preserved.
    x2 = x.reshape(B, K, C)
    bias2 = bias.reshape(N_out, 1)

    tm = N_out if tm is None else tm
    tn = C if tn is None else tn
    tk = min(K, 512) if tk is None else tk
    assert N_out % tm == 0 and C % tn == 0 and K % tk == 0
    assert (tm % 8 == 0 or tm == N_out) and (tn % 128 == 0 or tn == C)
    assert (tk % 8 == 0 or tk == K)

    grid = (B, N_out // tm, C // tn, K // tk)

    grid_spec = pltpu.PrefetchScalarGridSpec(
        num_scalar_prefetch=0,
        grid=grid,
        in_specs=[
            pl.BlockSpec((tm, tk),    lambda b, i, j, k: (i, k)),      # weight
            pl.BlockSpec((1, tk, tn), lambda b, i, j, k: (b, k, j)),   # x
            pl.BlockSpec((tm, 1),     lambda b, i, j, k: (i, 0)),      # bias
        ],
        out_specs=pl.BlockSpec((1, tm, tn), lambda b, i, j, k: (b, i, j)),
        scratch_shapes=[pltpu.VMEM((tm, tn), jnp.float32)],
    )

    out = pl.pallas_call(
        _bev_reduce_kernel,
        out_shape=jax.ShapeDtypeStruct((B, N_out, C), x.dtype),
        grid_spec=grid_spec,
        compiler_params=pltpu.CompilerParams(
            dimension_semantics=("parallel", "parallel", "parallel", "arbitrary")),
    )(w_t, x2, bias2)

    return out.reshape(B, h_out, w_out, C)


# ---------------------------------------------------------------------------
# Pure-JAX reference (mirrors the PyTorch forward exactly)
# ---------------------------------------------------------------------------
def reference(x, w_t, bias, h_out, w_out):
    B, H1, W1, C = x.shape
    xp = jnp.transpose(x, (0, 3, 1, 2)).reshape(B, C, H1 * W1)   # permute + view
    y = xp @ w_t.T + bias                                        # nn.Linear
    y = y.reshape(B, C, h_out, w_out)                            # view
    return jnp.transpose(y, (0, 2, 3, 1))                        # permute(0,2,3,1)


# ---------------------------------------------------------------------------
# Main
# ---------------------------------------------------------------------------
if __name__ == "__main__":
    # Scaled-down shapes consistent with the module (original: H1,W1=200,100 ->
    # H2,W2=100,50, C=256).  Here: 16x16 -> 8x8 spatial, C=256, batch=2.
    B, C = 2, 256
    H1, W1 = 16, 16
    H2, W2 = 8, 8
    K, N_OUT = H1 * W1, H2 * W2

    key = jax.random.PRNGKey(0)
    kx, kw, kb = jax.random.split(key, 3)

    x = jax.random.normal(kx, (B, H1, W1, C), dtype=jnp.float32)
    w_t = 0.05 * jax.random.normal(kw, (N_OUT, K), dtype=jnp.float32)   # torch (out, in)
    bias = 0.1 * jax.random.normal(kb, (N_OUT,), dtype=jnp.float32)

    out = bev_feature_reducer(x, w_t, bias, H2, W2, tm=N_OUT, tn=C, tk=128)
    out = jax.block_until_ready(out)

    ref = reference(x, w_t, bias, H2, W2)
    assert out.shape == (B, H2, W2, C), out.shape
    err = float(jnp.max(jnp.abs(out - ref)))
    assert jnp.allclose(out, ref, atol=2e-4, rtol=1e-4), err

    print("KERNEL_OK")
</pallas_src>

<mosaic_0001>
module attributes {stable_mosaic.version = 11 : i64} {
  func.func @_bev_reduce_kernel(%arg0: i32, %arg1: i32, %arg2: i32, %arg3: i32, %arg4: memref<64x128xf32, #tpu.memory_space<vmem>>, %arg5: memref<1x128x256xf32, #tpu.memory_space<vmem>>, %arg6: memref<64x1xf32, #tpu.memory_space<vmem>>, %arg7: memref<1x64x256xf32, #tpu.memory_space<vmem>>, %arg8: memref<64x256xf32, #tpu.memory_space<vmem>>) attributes {dimension_semantics = [#tpu.dimension_semantics<parallel>, #tpu.dimension_semantics<parallel>, #tpu.dimension_semantics<parallel>, #tpu.dimension_semantics<arbitrary>], iteration_bounds = array<i64: 2, 1, 1, 2>, scalar_prefetch = 0 : i64, scratch_operands = 1 : i64, tpu.core_type = #tpu.core_type<tc>, window_params = [{transform_indices = @transform_0, window_bounds = array<i64: 64, 128>}, {transform_indices = @transform_1, window_bounds = array<i64: 1, 128, 256>}, {transform_indices = @transform_2, window_bounds = array<i64: 64, 1>}, {transform_indices = @transform_3, window_bounds = array<i64: 1, 64, 256>}]} {
    %c0_i32 = arith.constant 0 : i32
    %0 = arith.cmpi eq, %arg3, %c0_i32 : i32
    %1 = arith.extui %0 : i1 to i32
    %c0_i32_0 = arith.constant 0 : i32
    %2 = arith.cmpi ne, %1, %c0_i32_0 : i32
    scf.if %2 {
      %cst_10 = arith.constant 0.000000e+00 : f32
      %13 = vector.broadcast %cst_10 : f32 to vector<64x256xf32>
      %c0_11 = arith.constant 0 : index
      %c0_12 = arith.constant 0 : index
      %14 = vector.load %arg8[%c0_11, %c0_12] : memref<64x256xf32, #tpu.memory_space<vmem>>, vector<64x256xf32>
      tpu.vector_store %arg8[%c0_11, %c0_12], %13 {strides = array<i32>} : memref<64x256xf32, #tpu.memory_space<vmem>>, vector<64x256xf32>,
    } else {
    }
    %c0 = arith.constant 0 : index
    %c0_1 = arith.constant 0 : index
    %3 = vector.load %arg8[%c0, %c0_1] : memref<64x256xf32, #tpu.memory_space<vmem>>, vector<64x256xf32>
    %c0_2 = arith.constant 0 : index
    %c0_3 = arith.constant 0 : index
    %4 = vector.load %arg4[%c0_2, %c0_3] : memref<64x128xf32, #tpu.memory_space<vmem>>, vector<64x128xf32>
    %c0_4 = arith.constant 0 : index
    %c0_5 = arith.constant 0 : index
    %c0_6 = arith.constant 0 : index
    %5 = vector.load %arg5[%c0_4, %c0_5, %c0_6] : memref<1x128x256xf32, #tpu.memory_space<vmem>>, vector<1x128x256xf32>
    %6 = vector.shape_cast %5 : vector<1x128x256xf32> to vector<128x256xf32>
    %cst = arith.constant dense<0.000000e+00> : vector<64x256xf32>
    %7 = tpu.matmul %4, %6, %cst {dimension_numbers = #tpu.dot_dimension_numbers<[1], [0], [0], [1], [0, 0, 1, 1], [], []>} : vector<64x128xf32>, vector<128x256xf32>, vector<64x256xf32> -> vector<64x256xf32>
    %8 = arith.addf %3, %7 : vector<64x256xf32>
    %c0_7 = arith.constant 0 : index
    %c0_8 = arith.constant 0 : index
    %9 = vector.load %arg8[%c0_7, %c0_8] : memref<64x256xf32, #tpu.memory_space<vmem>>, vector<64x256xf32>
    tpu.vector_store %arg8[%c0_7, %c0_8], %8 {strides = array<i32>} : memref<64x256xf32, #tpu.memory_space<vmem>>, vector<64x256xf32>,
    %c1_i32 = arith.constant 1 : i32
    %10 = arith.cmpi eq, %arg3, %c1_i32 : i32
    %11 = arith.extui %10 : i1 to i32
    %c0_i32_9 = arith.constant 0 : i32
    %12 = arith.cmpi ne, %11, %c0_i32_9 : i32
    scf.if %12 {
      %c0_10 = arith.constant 0 : index
      %c0_11 = arith.constant 0 : index
      %13 = vector.load %arg8[%c0_10, %c0_11] : memref<64x256xf32, #tpu.memory_space<vmem>>, vector<64x256xf32>
      %c0_12 = arith.constant 0 : index
      %c0_13 = arith.constant 0 : index
      %14 = vector.load %arg6[%c0_12, %c0_13] : memref<64x1xf32, #tpu.memory_space<vmem>>, vector<64x1xf32>
      %15 = vector.broadcast %14 : vector<64x1xf32> to vector<64x256xf32>
      %16 = arith.addf %13, %15 : vector<64x256xf32>
      %c0_14 = arith.constant 0 : index
      %c0_15 = arith.constant 0 : index
      %c0_16 = arith.constant 0 : index
      %17 = vector.load %arg7[%c0_14, %c0_15, %c0_16] : memref<1x64x256xf32, #tpu.memory_space<vmem>>, vector<1x64x256xf32>
      %18 = vector.shape_cast %17 : vector<1x64x256xf32> to vector<64x256xf32>
      %19 = vector.shape_cast %16 : vector<64x256xf32> to vector<1x64x256xf32>
      tpu.vector_store %arg7[%c0_14, %c0_15, %c0_16], %19 {strides = array<i32>} : memref<1x64x256xf32, #tpu.memory_space<vmem>>, vector<1x64x256xf32>,
    } else {
    }
    return
  }
  func.func @transform_0(%arg0: i32, %arg1: i32, %arg2: i32, %arg3: i32) -> (i32, i32) {
    %c0_i32 = arith.constant 0 : i32
    return %arg1, %arg3 : i32, i32
  }
  func.func @transform_1(%arg0: i32, %arg1: i32, %arg2: i32, %arg3: i32) -> (i32, i32, i32) {
    %c0_i32 = arith.constant 0 : i32
    return %arg0, %arg3, %arg2 : i32, i32, i32
  }
  func.func @transform_2(%arg0: i32, %arg1: i32, %arg2: i32, %arg3: i32) -> (i32, i32) {
    %c0_i32 = arith.constant 0 : i32
    %c0_i32_0 = arith.constant 0 : i32
    return %arg1, %c0_i32 : i32, i32
  }
  func.func @transform_3(%arg0: i32, %arg1: i32, %arg2: i32, %arg3: i32) -> (i32, i32, i32) {
    %c0_i32 = arith.constant 0 : i32
    return %arg0, %arg1, %arg2 : i32, i32, i32
  }
}

</mosaic_0001>

<bundles_post_ra>
// kernel: tpu_custom_call.1
= control target key start
LH: loop header
LB: loop body
LE: loop exit
PB: predicated region body
PF: predicated region fallthrough
CT: control target
= control target key end

     0   :  { %s1688_s0 = inlined_call_operand.hbm [shape: f32[64,256], index: 0, kind: input, shape index: {}]   ;;  %s1689_s1 = inlined_call_operand.hbm [shape: f32[2,256,256], index: 1, kind: input, shape index: {}]   ;;  %s1690_s2 = inlined_call_operand.vmem [shape: f32[64,1], index: 2, kind: input, shape index: {}]   ;;  %s1691_s3 = inlined_call_operand.hbm [shape: f32[2,64,256], index: 3, kind: output, shape index: {}]  }
   0x1   :  { %1702 = sst [smem:[#allocation19_spill]] %s1688_s0 }
   0x2   :  { %8 = vsyncpa [#allocation4], 0 }
   0x3   :  { %10 = vsyncpa [#allocation4 + $0x1], 0 }
   0x4   :  { %11 = vsyncpa [#allocation7], 0 }
   0x5   :  { %13 = vsyncpa [#allocation7 + $0x1], 0 }
   0x6   :  { %14 = vsyncpa [#allocation5], 0 }
   0x7   :  { %16 = vsyncpa [#allocation5 + $0x1], 0  ;;  %s1238_s12 = smov 0   ;;  %s1240_s13 = smov 0  }
   0x8   :  { %s1242_s14 = smov 0   ;;  %s1244_s15 = smov 0  }
   0x9   :  { %s1246_s16 = smov 0   ;;  %s1248_s17 = smov 0  }
   0xa   :  { %s1250_s18 = smov 0   ;;  %s1252_s19 = smov 0  }
   0xb   :  { %s1254_s20 = smov 0   ;;  %s1256_s21 = smov 0  }
   0xc   :  { %s1258_s22 = smov 0   ;;  %s1260_s23 = smov 0  }
   0xd   :  { %s1262_s24 = smov 0   ;;  %s1264_s25 = smov 0  }
   0xe LB: > { %1703 = sst [smem:[#allocation12_spill]] %s1172_s17  ;;  %s37_s26 = sadd.s32 1, %s1196_s23  ;;  %s1204_s25 = sphi %s1264_s25, %s22_s25   ;;  %s1200_s24 = sphi %s1262_s24, %s1749_s24   ;;  %s1196_s23 = sphi %s1260_s23, %s1748_s23   ;;  %s1192_s22 = sphi %s1258_s22, %s1747_s22   ;;  %s1188_s21 = sphi %s1256_s21, %s1746_s21   ;;  %s1184_s20 = sphi %s1254_s20, %s1735_s20   ;;  %s1180_s19 = sphi %s1252_s19, %s1745_s19   ;;  %s1176_s18 = sphi %s1250_s18, %s1744_s18   ;;  %s1172_s17 = sphi %s1248_s17, %s1743_s17   ;;  %s1168_s16 = sphi %s1246_s16, %s1742_s16   ;;  %s1164_s15 = sphi %s1244_s15, %s1741_s15   ;;  %s1160_s14 = sphi %s1242_s14, %s1740_s14   ;;  %s1156_s13 = sphi %s1240_s13, %s1739_s13   ;;  %s1152_s12 = sphi %s1238_s12, %s1738_s12  }
   0xf   : > { %1704 = sst [smem:[#allocation13_spill]] %s1184_s20  ;;  %p1310_p0 = scmp.ge.s32.totalorder %s37_s26, 2 }
  0x10   : > { %p64_p1 = scmp.ne.s32.totalorder %s1184_s20, %s1180_s19  ;;  %p1693_p2 = scmp.eq.s32.totalorder %s1204_s25, 0 }
  0x11   : > { %s1751_s26 = smov (%p1310_p0, %s37_s26), 0  ;;  %p1692_p5 = scmp.lt.s32.totalorder %s1204_s25, 4 }
  0x12   : > { %1706 = sst [smem:[#allocation14_spill]] %s1751_s26  ;;  %p66_p4 = por %p1693_p2, %p64_p1 }
  0x13   : > { %s189_s29 = sand.u32 1, %s1184_s20   ;;  %s785_s4 = sshll.u32 %s1196_s23, 7 }
  0x14   : > { %s784_s30 = sshll.u32 %s189_s29, 6  ;;  %s1707_s0 = sld [smem:[#allocation19_spill]] }
  0x15   : > { %s193_s8 = scalar_lea.vmem [#allocation3], %s784_s30  ;;  %p1337_p6 = pnand %p1692_p5, %p66_p4 }
  0x16   : > { %s202_s9 = sshll.u32 %s193_s8, 4  ;;  %s1341_s11 = scalar_lea.sflag [#allocation4], %s189_s29  ;;  %s1333_s9 = int_to_ptr.vmem [resolvable:$true] %s202_s9 }
  0x17   : > { %p996_p8 = pneg %p1337_p6 }
  0x1a   : > { %s1331_s7 = scalar_lea.hbm %s1707_s0, %s785_s4  ;;  %s999_s6 = scalar_lea.hbm %s1707_s0, 2048 }
  0x1b   : > { %s994_s5 = scalar_lea.hbm %s1331_s7, 1024  ;;  %p1000_p11 = scmp.lt.u32.totalorder %s1331_s7, %s1707_s0 }
  0x1c   : > { %p995_p7 = scmp.ne.s32.totalorder %s1331_s7, %s994_s5  ;;  %p1001_p12 = scmp.lt.u32.totalorder %s999_s6, %s994_s5 }
  0x1d   : > { %p1003_p1 = scmp.lt.u32.totalorder %s994_s5, %s1331_s7 }
  0x1e   : > { %p997_p9 = pnand %p996_p8, %p995_p7  ;;  %p1002_p13 = por %p1001_p12, %p1000_p11 }
  0x20   : > { %p998_p10 = pneg %p997_p9  ;;  %p1004_p4 = por %p1003_p1, %p1002_p13 }
  0x22   : > { %p1005_p5 = pnand %p1004_p4, %p998_p10 }
  0x24   : > { %1008 = shalt.err (!%p1005_p5)
}
  0x25   : > { %s1009_s29 = scalar_lea.vmem %s1333_s9, 1024  ;;  %s1206_s30 = smov [#allocation3]  }
  0x26   : > { %p1010_p7 = scmp.ne.s32.totalorder %s1333_s9, %s1009_s29  ;;  %s1014_s4 = sshll.u32 %s1206_s30, 4  ;;  %s1015_s4 = int_to_ptr.vmem [resolvable:$false] %s1014_s4 }
  0x27   : > { %s1016_s27 = scalar_lea.vmem %s1015_s4, 2048  ;;  %p1017_p3 = scmp.lt.s32.totalorder %s1333_s9, %s1015_s4 }
  0x28   : > { %p1012_p9 = pnand %p1010_p7, %p996_p8  ;;  %p1018_p11 = scmp.lt.s32.totalorder %s1016_s27, %s1009_s29 }
  0x2a   : > { %p1013_p2 = pneg %p1012_p9  ;;  %p1019_p12 = por %p1018_p11, %p1017_p3 }
  0x2c   : > { %p1020_p13 = pnand %p1019_p12, %p1013_p2 }
  0x2e   : > { %1023 = shalt.err (!%p1020_p13)
}
  0x2f   : > { %s1694_s5 = smov 256   ;;  %s1208_s6 = smov 128  }
  0x30   : > { %s1209_s8 = smov 8   ;;  %p791_p2 = scmp.ge.s32.totalorder %s1204_s25, 1 }
  0x31   : > { %861 = dma.hbm_to_vmem [thread:$0]  (!%p1337_p6), %s1331_s7, 1024, %s1333_s9, %s1341_s11, %s1694_s5, %s1208_s6, %s1209_s8  }
  0x32   : > { %p236_p3 = scmp.lt.s32.totalorder %s1204_s25, 5  ;;  %s779_s30 = sadd.s32 4294967295, %s1204_s25  }
  0x33   : > { %s780_s4 = sadd.s32 4294967294, %s1204_s25   ;;  %s48_s27 = sadd.s32 1, %s1200_s24 }
  0x34   : > { %p1372_p5 = pnand %p791_p2, %p236_p3  ;;  %s1753_s27 = smov (!%p1310_p0, %s48_s27), %s1200_s24 }
  0x35   : > { %s53_s10 = ssub.s32 %s1196_s23, %s1751_s26  ;;  %p1384_p6 = scmp.eq.s32.totalorder %s779_s30, 0 }
  0x36   : > { %p50_p8 = scmp.ge.s32.totalorder %s1753_s27, 2  ;;  %p55_p10 = scmp.eq.s32.totalorder %s53_s10, 0 }
  0x37   : > { %p1711_p1 = scmp.ne.s32.totalorder %s1180_s19, %s1176_s18  ;;  %s87_s28 = sadd.s32 1, %s1172_s17 }
  0x38   : > { %s1755_s27 = smov (%p50_p8, %s1753_s27), 0  ;;  %s1714_s11 = sadd.s32 1, %s1184_s20 }
  0x39   : > { %p1393_p4 = por %p1384_p6, %p1711_p1  ;;  %1713 = sst [smem:[#allocation15_spill]] %s1755_s27 }
  0x3a   : > { %s1403_s6 = scalar_select %p55_p10, %s1184_s20, %s1714_s11  }
  0x3b   : > { %s1712_s9 = scalar_select %p1393_p4, 1, 0 }
  0x3c   : > { %1715 = sst [smem:[#allocation16_spill]] %s1403_s6  ;;  %s80_s8 = ssub.s32 %s1200_s24, %s1755_s27 }
  0x3d   : > { %p94_p0 = scmp.ne.s32.totalorder %s1172_s17, %s1168_s16  ;;  %s82_s5 = sor.u32 %s80_s8, %s53_s10 }
  0x3e   : > { %p100_p7 = scmp.ne.s32.totalorder %s1168_s16, %s1164_s15  ;;  %p85_p9 = scmp.eq.s32.totalorder %s82_s5, 0 }
  0x3f   : > { %p1716_p11 = scmp.eq.s32.totalorder %s1204_s25, 0  ;;  %p141_p2 = scmp.eq.s32.totalorder %s80_s8, 0 }
  0x40   : > { %p1419_p13 = por %p100_p7, %p1384_p6  ;;  %s143_s27 = sadd.s32 1, %s1160_s14 }
  0x41   : > { %p1413_p12 = por %p94_p0, %p1716_p11  ;;  %p153_p3 = scmp.ne.s32.totalorder %s1160_s14, %s1156_s13 }
  0x42   : > { %s1718_s0 = scalar_select %p1419_p13, 1, 0 }
  0x43   : > { %s1424_s11 = scalar_select %p85_p9, %s1172_s17, %s87_s28  }
  0x44   : > { %s1430_s15 = scalar_select %p141_p2, %s1160_s14, %s143_s27  }
  0x45   : > { %1719 = sst [smem:[#allocation17_spill]] %s1424_s11  ;;  %p154_p8 = scmp.eq.s32.totalorder %s779_s30, 3 }
  0x46   : > { %1720 = sst [smem:[#allocation18_spill]] %s1430_s15  ;;  %p159_p10 = scmp.ne.s32.totalorder %s1156_s13, %s1152_s12 }
  0x47   : > { %p160_p1 = scmp.eq.s32.totalorder %s780_s4, 3  ;;  %s212_s5 = sand.u32 1, %s1172_s17  }
  0x48   : > { %p1435_p0 = por %p154_p8, %p153_p3  ;;  %s786_s28 = sshll.u32 %s212_s5, 8 }
  0x49   : > { %p1439_p6 = por %p160_p1, %p159_p10  ;;  %s802_s8 = sshll.u32 %s1196_s23, 5 }
  0x4a   : > { %s1721_s10 = scalar_select %p1435_p0, 1, 0 }
  0x4b   : > { %s1722_s7 = scalar_select %p1439_p6, 1, 0 }
  0x4c   : > { %s789_s26 = sshll.u32 %s1200_s24, 6  ;;  %s216_s6 = scalar_lea.vmem [#allocation6], %s786_s28 }
  0x4d   : > { %s228_s20 = sshll.u32 %s216_s6, 4  ;;  %s225_s11 = sadd.s32 %s802_s8, %s789_s26  ;;  %s1445_s20 = int_to_ptr.vmem [resolvable:$true] %s228_s20 }
  0x4e   : > { %s790_s30 = sshll.u32 %s225_s11, 7  ;;  %p1723_p7 = scmp.lt.s32.totalorder %s1204_s25, 4 }
  0x4f   : > { %s1458_s15 = scalar_lea.hbm %s1689_s1, %s790_s30  ;;  %s1460_s26 = scalar_lea.sflag [#allocation7], %s212_s5 }
  0x50   : > { %p1451_p9 = pnand %p1723_p7, %p1413_p12  ;;  %s1024_s6 = scalar_lea.hbm %s1458_s15, 4096 }
  0x51   : > { %p1025_p11 = scmp.ne.s32.totalorder %s1458_s15, %s1024_s6  ;;  %s1029_s11 = scalar_lea.hbm %s1689_s1, 16384 }
  0x52   : > { %p1026_p12 = pneg %p1451_p9  ;;  %p1030_p8 = scmp.lt.u32.totalorder %s1458_s15, %s1689_s1 }
  0x53   : > { %p1031_p10 = scmp.lt.u32.totalorder %s1029_s11, %s1024_s6  ;;  %p1033_p7 = scmp.lt.u32.totalorder %s1024_s6, %s1458_s15 }
  0x54   : > { %p1027_p2 = pnand %p1026_p12, %p1025_p11 }
  0x55   : > { %p1032_p1 = por %p1031_p10, %p1030_p8 }
  0x56   : > { %p1028_p3 = pneg %p1027_p2 }
  0x57   : > { %p1034_p6 = por %p1033_p7, %p1032_p1 }
  0x59   : > { %p1035_p0 = pnand %p1034_p6, %p1028_p3 }
  0x5b   : > { %1038 = shalt.err (!%p1035_p0)
}
  0x5c   : > { %s1039_s5 = scalar_lea.vmem %s1445_s20, 4096  ;;  %s1210_s30 = smov [#allocation6]  }
  0x5d   : > { %p1040_p11 = scmp.ne.s32.totalorder %s1445_s20, %s1039_s5  ;;  %s1044_s27 = sshll.u32 %s1210_s30, 4  ;;  %s1045_s27 = int_to_ptr.vmem [resolvable:$false] %s1044_s27 }
  0x5e   : > { %s1046_s18 = scalar_lea.vmem %s1045_s27, 8192  ;;  %p1047_p4 = scmp.lt.s32.totalorder %s1445_s20, %s1045_s27 }
  0x5f   : > { %p1042_p2 = pnand %p1040_p11, %p1026_p12  ;;  %p1048_p8 = scmp.lt.s32.totalorder %s1046_s18, %s1039_s5 }
  0x61   : > { %p1043_p13 = pneg %p1042_p2  ;;  %p1049_p10 = por %p1048_p8, %p1047_p4 }
  0x63   : > { %p1050_p1 = pnand %p1049_p10, %p1043_p13 }
  0x65   : > { %1053 = shalt.err (!%p1050_p1)
}
  0x66   : > { %s1211_s6 = smov 16   ;;  %s1725_s17 = smov 256  }
  0x67   : > { %864 = dma.hbm_to_vmem [thread:$0]  (!%p1451_p9), %s1458_s15, 4096, %s1445_s20, %s1460_s26, %s1725_s17, %s1725_s17, %s1211_s6  }
  0x68   : > { %240 = sbr.rel (%p1372_p5) target bundleno = 426 (0x1aa), region = 32  ;;  %s242_s11 = sand.u32 (!%p1372_p5), 1, %s1180_s19  }
  0x69   : > { %s792_s28 = sshll.u32 (!%p1372_p5), %s242_s11, 6  ;;  %s243_s8 = scalar_lea.sflag (!%p1372_p5), [#allocation4], %s242_s11 }
  0x6a   : > { %s1493_s5 = scalar_lea.vmem (!%p1372_p5), [#allocation3], %s792_s28  ;;  %p1726_p4 = scmp.ne.s32.totalorder (!%p1372_p5), %s1712_s9, 0 }
  0x6f   : > { %1139 = dma.done.wait (%p1726_p4), %s243_s8, 1024  }
  0x70   : > { %1141 = vsyncadd (%p1726_p4), %s243_s8, 4294966272  ;;  %s251_s4 = sand.u32 1, %s1168_s16   ;;  %p1727_p5 = scmp.ne.s32.totalorder %s1718_s0, 0 }
  0x71   : > { %s793_s30 = sshll.u32 %s251_s4, 8  ;;  %s252_s20 = scalar_lea.sflag [#allocation7], %s251_s4 }
  0x72   : > { %s1500_s15 = scalar_lea.vmem [#allocation6], %s793_s30 }
  0x73   : > { %1143 = dma.done.wait (%p1727_p5), %s252_s20, 4096  }
  0x74   : > { %1145 = vsyncadd (%p1727_p5), %s252_s20, 4294963200  ;;  %s285_s29 = sand.u32 1, %s1156_s13   ;;  %p795_p13 = scmp.ne.s32.totalorder %s1188_s21, 0 }
  0x75   : > { %s794_s26 = sshll.u32 %s285_s29, 7  ;;  %v1212_v0 = vmov (!%p795_p13), 0.0  }
  0x76   : > { %s1509_s27 = scalar_lea.vmem [#allocation8], %s794_s26  ;;  %302 = sbr.rel (%p795_p13) target bundleno = 126 (0x7e), region = 44  ;;  %303 = vst [vmem:[#allocation2] sm:$0xff] (!%p795_p13), %v1212_v0  ;;  %304 = vst [vmem:[#allocation2 + $0x8] sm:$0xff] (!%p795_p13), %v1212_v0 }
  0x77   : > { %305 = vst [vmem:[#allocation2 + $0x10] sm:$0xff] (!%p795_p13), %v1212_v0  ;;  %306 = vst [vmem:[#allocation2 + $0x18] sm:$0xff] (!%p795_p13), %v1212_v0 }
  0x78   : > { %307 = vst [vmem:[#allocation2 + $0x20] sm:$0xff] (!%p795_p13), %v1212_v0  ;;  %308 = vst [vmem:[#allocation2 + $0x28] sm:$0xff] (!%p795_p13), %v1212_v0 }
  0x79   : > { %309 = vst [vmem:[#allocation2 + $0x30] sm:$0xff] (!%p795_p13), %v1212_v0  ;;  %310 = vst [vmem:[#allocation2 + $0x38] sm:$0xff] (!%p795_p13), %v1212_v0 }
  0x7a   : > { %311 = vst [vmem:[#allocation2 + $0x40] sm:$0xff] (!%p795_p13), %v1212_v0  ;;  %312 = vst [vmem:[#allocation2 + $0x48] sm:$0xff] (!%p795_p13), %v1212_v0 }
  0x7b   : > { %313 = vst [vmem:[#allocation2 + $0x50] sm:$0xff] (!%p795_p13), %v1212_v0  ;;  %314 = vst [vmem:[#allocation2 + $0x58] sm:$0xff] (!%p795_p13), %v1212_v0 }
  0x7c   : > { %315 = vst [vmem:[#allocation2 + $0x60] sm:$0xff] (!%p795_p13), %v1212_v0  ;;  %316 = vst [vmem:[#allocation2 + $0x68] sm:$0xff] (!%p795_p13), %v1212_v0 }
  0x7d   : > { %317 = vst [vmem:[#allocation2 + $0x70] sm:$0xff] %v1212_v0  ;;  %318 = vst [vmem:[#allocation2 + $0x78] sm:$0xff] %v1212_v0 }
  0x7e PF: > { %v344_v1 = vld [vmem:[%s1500_s15 + $0x8] sm:$0xff]  ;;  %v346_v2 = vld [vmem:[%s1500_s15 + $0x18] sm:$0xff]  ;;  %v343_v3 = vld [vmem:[%s1500_s15] sm:$0xff]  ;;  %v1213_v8 = vmov 0.0   ;;  %p796_p0 = scmp.ne.s32.totalorder %s1188_s21, 1 }
  0x7f   : > { %v804_v4 = vpack.c.bf16 %v346_v2, %v344_v1  ;;  %v345_v5 = vld [vmem:[%s1500_s15 + $0x10] sm:$0xff]  ;;  %v348_v6 = vld [vmem:[%s1500_s15 + $0x28] sm:$0xff]  ;;  %v350_v7 = vld [vmem:[%s1500_s15 + $0x38] sm:$0xff]  ;;  %439 = vmatprep.mubr.f32.mxu0 %v1213_v8  ;;  %463 = vmatprep.mubr.f32.mxu1 %v1213_v8 }
  0x80   : > { %v806_v9 = vpack.c.bf16 %v345_v5, %v343_v3  ;;  %v808_v10 = vpack.c.bf16 %v350_v7, %v348_v6  ;;  %v347_v11 = vld [vmem:[%s1500_s15 + $0x20] sm:$0xff]  ;;  %v349_v12 = vld [vmem:[%s1500_s15 + $0x30] sm:$0xff]  ;;  %v352_v13 = vld [vmem:[%s1500_s15 + $0x48] sm:$0xff] }
  0x81   : > { %805 = vmatprep.subr.bf16.mxu0 %v804_v4  ;;  %836 = vmatprep.subr.bf16.mxu1 %v804_v4  ;;  %v354_v14 = vld [vmem:[%s1500_s15 + $0x58] sm:$0xff]  ;;  %v810_v15 = vpack.c.bf16 %v349_v12, %v347_v11  ;;  %v351_v17 = vld [vmem:[%s1500_s15 + $0x40] sm:$0xff]  ;;  %v353_v18 = vld [vmem:[%s1500_s15 + $0x50] sm:$0xff] }
  0x82   : > { %807 = vmatpush1.bf16.msra.mxu0 %v806_v9  ;;  %844 = vmatpush1.bf16.msra.mxu1 %v806_v9  ;;  %v812_v16 = vpack.c.bf16 %v354_v14, %v352_v13  ;;  %v356_v19 = vld [vmem:[%s1500_s15 + $0x68] sm:$0xff]  ;;  %v358_v20 = vld [vmem:[%s1500_s15 + $0x78] sm:$0xff]  ;;  %v814_v21 = vpack.c.bf16 %v353_v18, %v351_v17  ;;  %v355_v23 = vld [vmem:[%s1500_s15 + $0x60] sm:$0xff] }
  0x83   : > { %809 = vmatprep.subr.bf16.mxu0 %v808_v10  ;;  %837 = vmatprep.subr.bf16.mxu1 %v808_v10  ;;  %v816_v22 = vpack.c.bf16 %v358_v20, %v356_v19  ;;  %v357_v24 = vld [vmem:[%s1500_s15 + $0x70] sm:$0xff]  ;;  %v360_v25 = vld [vmem:[%s1500_s15 + $0x88] sm:$0xff]  ;;  %v362_v26 = vld [vmem:[%s1500_s15 + $0x98] sm:$0xff] }
  0x84   : > { %v818_v27 = vpack.c.bf16 %v357_v24, %v355_v23  ;;  %v820_v28 = vpack.c.bf16 %v362_v26, %v360_v25  ;;  %v359_v29 = vld [vmem:[%s1500_s15 + $0x80] sm:$0xff]  ;;  %v361_v30 = vld [vmem:[%s1500_s15 + $0x90] sm:$0xff]  ;;  %v364_v31 = vld [vmem:[%s1500_s15 + $0xa8] sm:$0xff] }
  0x85   : > { %v366_v32 = vld [vmem:[%s1500_s15 + $0xb8] sm:$0xff]  ;;  %v822_v33 = vpack.c.bf16 %v361_v30, %v359_v29  ;;  %v363_v35 = vld [vmem:[%s1500_s15 + $0xa0] sm:$0xff]  ;;  %v365_v36 = vld [vmem:[%s1500_s15 + $0xb0] sm:$0xff] }
  0x86   : > { %811 = vmatpush1.bf16.msra.mxu0 %v810_v15  ;;  %845 = vmatpush1.bf16.msra.mxu1 %v810_v15  ;;  %v824_v34 = vpack.c.bf16 %v366_v32, %v364_v31  ;;  %v368_v37 = vld [vmem:[%s1500_s15 + $0xc8] sm:$0xff]  ;;  %v370_v38 = vld [vmem:[%s1500_s15 + $0xd8] sm:$0xff]  ;;  %v826_v39 = vpack.c.bf16 %v365_v36, %v363_v35  ;;  %v367_v41 = vld [vmem:[%s1500_s15 + $0xc0] sm:$0xff] }
  0x87   : > { %813 = vmatprep.subr.bf16.mxu0 %v812_v16  ;;  %838 = vmatprep.subr.bf16.mxu1 %v812_v16  ;;  %v828_v40 = vpack.c.bf16 %v370_v38, %v368_v37  ;;  %v369_v42 = vld [vmem:[%s1500_s15 + $0xd0] sm:$0xff]  ;;  %v372_v43 = vld [vmem:[%s1500_s15 + $0xe8] sm:$0xff]  ;;  %v374_v44 = vld [vmem:[%s1500_s15 + $0xf8] sm:$0xff] }
  0x88   : > { %v830_v45 = vpack.c.bf16 %v369_v42, %v367_v41  ;;  %v832_v46 = vpack.c.bf16 %v374_v44, %v372_v43  ;;  %v371_v47 = vld [vmem:[%s1500_s15 + $0xe0] sm:$0xff]  ;;  %v373_v48 = vld [vmem:[%s1500_s15 + $0xf0] sm:$0xff]  ;;  %v336_v52 = vld [vmem:[%s1493_s5 + $0x8] sm:$0xff]  ;;  %v1214_v44 = vmov (!%p796_p0), 0  }
  0x89   : > { %v834_v49 = vpack.c.bf16 %v373_v48, %v371_v47  ;;  %v335_v50 = vld [vmem:[%s1493_s5] sm:$0xff]  ;;  %v340_v53 = vld [vmem:[%s1493_s5 + $0x28] sm:$0xff]  ;;  %v337_v54 = vld [vmem:[%s1493_s5 + $0x10] sm:$0xff]  ;;  %993 = vset.pattern.permute.xlu1 (!%p796_p0), %v1214_v44  ;;  %992 = vset.pattern.permute.xlu0 (!%p796_p0), %v1214_v44 }
  0x8a   : > { %815 = vmatpush1.bf16.msra.mxu0 %v814_v21  ;;  %846 = vmatpush1.bf16.msra.mxu1 %v814_v21  ;;  %v339_v51 = vld [vmem:[%s1493_s5 + $0x20] sm:$0xff]  ;;  %v341_v55 = vld [vmem:[%s1493_s5 + $0x30] sm:$0xff]  ;;  %v338_v56 = vld [vmem:[%s1493_s5 + $0x18] sm:$0xff] }
  0x8b   : > { %817 = vmatprep.subr.bf16.mxu0 %v816_v22  ;;  %839 = vmatprep.subr.bf16.mxu1 %v816_v22  ;;  %v342_v57 = vld [vmem:[%s1493_s5 + $0x38] sm:$0xff]  ;;  %v319_v58 = vld [vmem:[#allocation2] sm:$0xff]  ;;  %v320_v60 = vld [vmem:[#allocation2 + $0x8] sm:$0xff] }
  0x8c   : > { %v327_v59 = vld [vmem:[#allocation2 + $0x40] sm:$0xff]  ;;  %v328_v61 = vld [vmem:[#allocation2 + $0x48] sm:$0xff]  ;;  %v321_v6 = vld [vmem:[#allocation2 + $0x10] sm:$0xff] }
  0x8d   : > { %v329_v7 = vld [vmem:[#allocation2 + $0x50] sm:$0xff]  ;;  %v330_v9 = vld [vmem:[#allocation2 + $0x58] sm:$0xff]  ;;  %v323_v18 = vld [vmem:[#allocation2 + $0x20] sm:$0xff] }
  0x8e   : > { %819 = vmatpush1.bf16.msra.mxu0 %v818_v27  ;;  %847 = vmatpush1.bf16.msra.mxu1 %v818_v27  ;;  %v331_v19 = vld [vmem:[#allocation2 + $0x60] sm:$0xff]  ;;  %v324_v20 = vld [vmem:[#allocation2 + $0x28] sm:$0xff]  ;;  %v325_v30 = vld [vmem:[#allocation2 + $0x30] sm:$0xff] }
  0x8f   : > { %821 = vmatprep.subr.bf16.mxu0 %v820_v28  ;;  %840 = vmatprep.subr.bf16.mxu1 %v820_v28  ;;  %v332_v21 = vld [vmem:[#allocation2 + $0x68] sm:$0xff]  ;;  %v333_v31 = vld [vmem:[#allocation2 + $0x70] sm:$0xff]  ;;  %v326_v32 = vld [vmem:[#allocation2 + $0x38] sm:$0xff] }
  0x90   : > { %v542_v42 = vld [vmem:[%s1690_s2 + $0x10] sm:$0xff] (!%p796_p0)  ;;  %v540_v43 = vld [vmem:[%s1690_s2] sm:$0xff] (!%p796_p0)  ;;  %v545_v47 = vld [vmem:[%s1690_s2 + $0x28] sm:$0xff] (!%p796_p0) }
  0x91   : > { %560 = vperm.xlu1 (!%p796_p0), %993, %v542_v42   ;;  %550 = vperm.xlu0 (!%p796_p0), %992, %v540_v43   ;;  %v544_v48 = vld [vmem:[%s1690_s2 + $0x20] sm:$0xff] (!%p796_p0) }
  0x92   : > { %823 = vmatpush1.bf16.msra.mxu0 %v822_v33  ;;  %848 = vmatpush1.bf16.msra.mxu1 %v822_v33  ;;  %v334_v33 = vld [vmem:[#allocation2 + $0x78] sm:$0xff] }
  0x93   : > { %825 = vmatprep.subr.bf16.mxu0 %v824_v34  ;;  %841 = vmatprep.subr.bf16.mxu1 %v824_v34 }
  0x96   : > { %827 = vmatpush1.bf16.msra.mxu0 %v826_v39  ;;  %849 = vmatpush1.bf16.msra.mxu1 %v826_v39 }
  0x97   : > { %829 = vmatprep.subr.bf16.mxu0 %v828_v40  ;;  %842 = vmatprep.subr.bf16.mxu1 %v828_v40 }
  0x9a   : > { %831 = vmatpush1.bf16.msra.mxu0 %v830_v45  ;;  %850 = vmatpush1.bf16.msra.mxu1 %v830_v45  ;;  %v543_v45 = vld [vmem:[%s1690_s2 + $0x18] sm:$0xff] (!%p796_p0) }
  0x9b   : > { %833 = vmatprep.subr.bf16.mxu0 %v832_v46  ;;  %843 = vmatprep.subr.bf16.mxu1 %v832_v46  ;;  %v541_v46 = vld [vmem:[%s1690_s2 + $0x8] sm:$0xff] (!%p796_p0) }
  0x9c   : > { %565 = vperm.xlu1 (!%p796_p0), %993, %v543_v45   ;;  %555 = vperm.xlu0 (!%p796_p0), %992, %v541_v46  }
  0x9e   : > { %835 = vmatpush1.bf16.msra.mxu0 %v834_v49  ;;  %851 = vmatpush1.bf16.msra.mxu1 %v834_v49  ;;  %v547_v49 = vld [vmem:[%s1690_s2 + $0x38] sm:$0xff] (!%p796_p0) }
  0xa0   : > { %575 = vperm.xlu1 (!%p796_p0), %993, %v545_v47   ;;  %570 = vperm.xlu0 (!%p796_p0), %992, %v544_v48  }
  0xa1   : > { %440 = vmatmul.mubr.f32.vlgmr.msra.gmra.mrb[0].mxu0 %v335_v50  ;;  %464 = vmatmul.mubr.f32.vlgmr.msra.gmra.mrb[0].mxu1 %v339_v51  ;;  %v546_v50 = vld [vmem:[%s1690_s2 + $0x30] sm:$0xff] (!%p796_p0) }
  0xa2   : > { %445 = vmatprep.mubr.f32.mxu0 %v1213_v8  ;;  %469 = vmatprep.mubr.f32.mxu1 %v1213_v8 }
  0xa4   : > { %585 = vperm.xlu1 (!%p796_p0), %993, %v547_v49   ;;  %580 = vperm.xlu0 (!%p796_p0), %992, %v546_v50  }
  0xa5   : > { %446 = vmatmul.mubr.f32.gmra.mrb[2].mxu0 %v336_v52  ;;  %470 = vmatmul.mubr.f32.gmra.mrb[2].mxu1 %v340_v53 }
  0xa6   : > { %451 = vmatprep.mubr.f32.mxu0 %v1213_v8  ;;  %475 = vmatprep.mubr.f32.mxu1 %v1213_v8 }
  0xa9   : > { %452 = vmatmul.mubr.f32.gmra.mrb[4].mxu0 %v337_v54  ;;  %476 = vmatmul.mubr.f32.gmra.mrb[4].mxu1 %v341_v55 }
  0xaa   : > { %457 = vmatprep.mubr.f32.mxu0 %v1213_v8  ;;  %481 = vmatprep.mubr.f32.mxu1 %v1213_v8  ;;  %v322_v8 = vld [vmem:[#allocation2 + $0x18] sm:$0xff] }
  0xad   : > { %458 = vmatmul.mubr.f32.gmra.mrb[6].mxu0 %v338_v56  ;;  %482 = vmatmul.mubr.f32.gmra.mrb[6].mxu1 %v342_v57 }
 0x110   : > { %v561_v55 = vpop.permute.xlu1 (!%p796_p0), %560  ;;  %v551_v56 = vpop.permute.xlu0 (!%p796_p0), %550 }
 0x174   : > { %v441_v62 = vpop.f32.mrb[0].mxu0  ;;  %v465_v63 = vpop.f32.mrb[0].mxu1 }
 0x175   : > { %v488_v0 = vadd.f32 %v441_v62, %v319_v58  ;;  %v496_v1 = vadd.f32 %v465_v63, %v327_v59  ;;  %v443_v2 = vpop.f32.mrb[1].mxu0  ;;  %v467_v3 = vpop.f32.mrb[1].mxu1 }
 0x176   : > { %v489_v4 = vadd.f32 %v443_v2, %v320_v60  ;;  %v497_v5 = vadd.f32 %v467_v3, %v328_v61  ;;  %v556_v2 = vpop.permute.xlu0 (!%p796_p0), %555 }
 0x177   : > { %504 = vst [vmem:[#allocation2] sm:$0xff] %v488_v0  ;;  %512 = vst [vmem:[#allocation2 + $0x40] sm:$0xff] %v496_v1  ;;  %v566_v1 = vpop.permute.xlu1 (!%p796_p0), %565 }
 0x178   : > { %505 = vst [vmem:[#allocation2 + $0x8] sm:$0xff] %v489_v4  ;;  %513 = vst [vmem:[#allocation2 + $0x48] sm:$0xff] %v497_v5  ;;  %v447_v10 = vpop.f32.mrb[2].mxu0  ;;  %v471_v11 = vpop.f32.mrb[2].mxu1 }
 0x179   : > { %v490_v12 = vadd.f32 %v447_v10, %v321_v6  ;;  %v498_v13 = vadd.f32 %v471_v11, %v329_v7  ;;  %v449_v14 = vpop.f32.mrb[3].mxu0  ;;  %v473_v15 = vpop.f32.mrb[3].mxu1 }
 0x17a   : > { %v491_v16 = vadd.f32 %v449_v14, %v322_v8  ;;  %v499_v17 = vadd.f32 %v473_v15, %v330_v9 }
 0x17b   : > { %506 = vst [vmem:[#allocation2 + $0x10] sm:$0xff] %v490_v12  ;;  %514 = vst [vmem:[#allocation2 + $0x50] sm:$0xff] %v498_v13  ;;  %v576_v11 = vpop.permute.xlu1 (!%p796_p0), %575  ;;  %v571_v12 = vpop.permute.xlu0 (!%p796_p0), %570 }
 0x17c   : > { %507 = vst [vmem:[#allocation2 + $0x18] sm:$0xff] %v491_v16  ;;  %515 = vst [vmem:[#allocation2 + $0x58] sm:$0xff] %v499_v17  ;;  %v453_v22 = vpop.f32.mrb[4].mxu0  ;;  %v477_v23 = vpop.f32.mrb[4].mxu1 }
 0x17d   : > { %v492_v24 = vadd.f32 %v453_v22, %v323_v18  ;;  %v500_v25 = vadd.f32 %v477_v23, %v331_v19  ;;  %v455_v26 = vpop.f32.mrb[5].mxu0  ;;  %v479_v27 = vpop.f32.mrb[5].mxu1 }
 0x17e   : > { %v493_v28 = vadd.f32 %v455_v26, %v324_v20  ;;  %v501_v29 = vadd.f32 %v479_v27, %v332_v21  ;;  %523 = sbr.rel (%p796_p0) target bundleno = 400 (0x190), region = 48  ;;  %v524_v53 = vld [vmem:[#allocation2] sm:$0xff] (!%p796_p0) }
 0x17f   : > { %508 = vst [vmem:[#allocation2 + $0x20] sm:$0xff] %v492_v24  ;;  %516 = vst [vmem:[#allocation2 + $0x60] sm:$0xff] %v500_v25  ;;  %v525_v54 = vld [vmem:[#allocation2 + $0x8] sm:$0xff] (!%p796_p0)  ;;  %v588_v59 = vadd.f32 (!%p796_p0), %v551_v56, %v524_v53  ;;  %v532_v9 = vld [vmem:[#allocation2 + $0x40] sm:$0xff] (!%p796_p0)  ;;  %v586_v21 = vpop.permute.xlu1 (!%p796_p0), %585  ;;  %v581_v22 = vpop.permute.xlu0 (!%p796_p0), %580 }
 0x180   : > { %509 = vst [vmem:[#allocation2 + $0x28] sm:$0xff] %v493_v28  ;;  %517 = vst [vmem:[#allocation2 + $0x68] sm:$0xff] %v501_v29  ;;  %v459_v34 = vpop.f32.mrb[6].mxu0  ;;  %v483_v35 = vpop.f32.mrb[6].mxu1  ;;  %v589_v60 = vadd.f32 (!%p796_p0), %v551_v56, %v525_v54  ;;  %v533_v10 = vld [vmem:[#allocation2 + $0x48] sm:$0xff] (!%p796_p0)  ;;  %v596_v15 = vadd.f32 (!%p796_p0), %v571_v12, %v532_v9 }
 0x181   : > { %v494_v36 = vadd.f32 %v459_v34, %v325_v30  ;;  %v502_v37 = vadd.f32 %v483_v35, %v333_v31  ;;  %v461_v38 = vpop.f32.mrb[7].mxu0  ;;  %v485_v39 = vpop.f32.mrb[7].mxu1  ;;  %604 = vst [vmem:[%s1509_s27] sm:$0xff] (!%p796_p0), %v588_v59  ;;  %v597_v16 = vadd.f32 (!%p796_p0), %v571_v12, %v533_v10 }
 0x182   : > { %v495_v40 = vadd.f32 %v461_v38, %v326_v32  ;;  %v503_v41 = vadd.f32 %v485_v39, %v334_v33  ;;  %v526_v63 = vld [vmem:[#allocation2 + $0x10] sm:$0xff] (!%p796_p0)  ;;  %605 = vst [vmem:[%s1509_s27 + $0x8] sm:$0xff] (!%p796_p0), %v589_v60  ;;  %612 = vst [vmem:[%s1509_s27 + $0x40] sm:$0xff] (!%p796_p0), %v596_v15 }
 0x183   : > { %510 = vst [vmem:[#allocation2 + $0x30] sm:$0xff] %v494_v36  ;;  %518 = vst [vmem:[#allocation2 + $0x70] sm:$0xff] %v502_v37  ;;  %v527_v0 = vld [vmem:[#allocation2 + $0x18] sm:$0xff] (!%p796_p0)  ;;  %v590_v5 = vadd.f32 (!%p796_p0), %v556_v2, %v526_v63  ;;  %v534_v7 = vld [vmem:[#allocation2 + $0x50] sm:$0xff] (!%p796_p0) }
 0x184   : > { %511 = vst [vmem:[#allocation2 + $0x38] sm:$0xff] %v495_v40  ;;  %519 = vst [vmem:[#allocation2 + $0x78] sm:$0xff] %v503_v41  ;;  %v591_v6 = vadd.f32 (!%p796_p0), %v556_v2, %v527_v0  ;;  %v535_v8 = vld [vmem:[#allocation2 + $0x58] sm:$0xff] (!%p796_p0)  ;;  %v598_v13 = vadd.f32 (!%p796_p0), %v576_v11, %v534_v7 }
 0x185   : > { %606 = vst [vmem:[%s1509_s27 + $0x10] sm:$0xff] %v590_v5  ;;  %v599_v14 = vadd.f32 %v576_v11, %v535_v8  ;;  %613 = vst [vmem:[%s1509_s27 + $0x48] sm:$0xff] %v597_v16 }
 0x186   : > { %v528_v51 = vld [vmem:[#allocation2 + $0x20] sm:$0xff]  ;;  %607 = vst [vmem:[%s1509_s27 + $0x18] sm:$0xff] %v591_v6  ;;  %614 = vst [vmem:[%s1509_s27 + $0x50] sm:$0xff] %v598_v13 }
 0x187   : > { %v529_v52 = vld [vmem:[#allocation2 + $0x28] sm:$0xff]  ;;  %v592_v57 = vadd.f32 %v561_v55, %v528_v51  ;;  %v536_v19 = vld [vmem:[#allocation2 + $0x60] sm:$0xff]  ;;  %615 = vst [vmem:[%s1509_s27 + $0x58] sm:$0xff] %v599_v14 }
 0x188   : > { %v593_v58 = vadd.f32 %v561_v55, %v529_v52  ;;  %v537_v20 = vld [vmem:[#allocation2 + $0x68] sm:$0xff]  ;;  %v600_v25 = vadd.f32 %v581_v22, %v536_v19 }
 0x189   : > { %608 = vst [vmem:[%s1509_s27 + $0x20] sm:$0xff] %v592_v57  ;;  %v601_v26 = vadd.f32 %v581_v22, %v537_v20 }
 0x18a   : > { %v530_v61 = vld [vmem:[#allocation2 + $0x30] sm:$0xff]  ;;  %609 = vst [vmem:[%s1509_s27 + $0x28] sm:$0xff] %v593_v58  ;;  %616 = vst [vmem:[%s1509_s27 + $0x60] sm:$0xff] %v600_v25 }
 0x18b   : > { %v531_v62 = vld [vmem:[#allocation2 + $0x38] sm:$0xff]  ;;  %v594_v3 = vadd.f32 %v566_v1, %v530_v61  ;;  %v538_v17 = vld [vmem:[#allocation2 + $0x70] sm:$0xff]  ;;  %617 = vst [vmem:[%s1509_s27 + $0x68] sm:$0xff] %v601_v26 }
 0x18c   : > { %v595_v4 = vadd.f32 %v566_v1, %v531_v62  ;;  %v539_v18 = vld [vmem:[#allocation2 + $0x78] sm:$0xff]  ;;  %v602_v23 = vadd.f32 %v586_v21, %v538_v17 }
 0x18d   : > { %610 = vst [vmem:[%s1509_s27 + $0x30] sm:$0xff] %v594_v3  ;;  %v603_v24 = vadd.f32 %v586_v21, %v539_v18 }
 0x18e   : > { %611 = vst [vmem:[%s1509_s27 + $0x38] sm:$0xff] %v595_v4  ;;  %618 = vst [vmem:[%s1509_s27 + $0x70] sm:$0xff] %v602_v23 }
 0x18f   : > { %619 = vst [vmem:[%s1509_s27 + $0x78] sm:$0xff] %v603_v24 }
 0x190 PF: > { %s803_s9 = sshll.u32 %s1192_s22, 11  ;;  %s639_s11 = sshll.u32 %s1509_s27, 4  ;;  %s1608_s11 = int_to_ptr.vmem [resolvable:$true] %s639_s11 }
 0x191   : > { %s1605_s17 = scalar_lea.hbm %s1691_s3, %s803_s9  ;;  %s1612_s28 = scalar_lea.sflag [#allocation5], %s285_s29 }
 0x192   : > { %s1054_s21 = scalar_lea.vmem %s1608_s11, 2048  ;;  %p1728_p9 = scmp.ne.s32.totalorder %s1721_s10, 0 }
 0x193   : > { %p1055_p6 = scmp.ne.s32.totalorder %s1608_s11, %s1054_s21  ;;  %s1215_s22 = smov [#allocation8]  }
 0x194   : > { %s1058_s8 = sshll.u32 %s1215_s22, 4  ;;  %s1059_s8 = int_to_ptr.vmem [resolvable:$false] %s1058_s8 }
 0x195   : > { %p1056_p12 = pnand %p1055_p6, %p1728_p9  ;;  %s1060_s5 = scalar_lea.vmem %s1059_s8, 4096 }
 0x196   : > { %p1061_p7 = scmp.lt.s32.totalorder %s1608_s11, %s1059_s8  ;;  %p1062_p11 = scmp.lt.s32.totalorder %s1060_s5, %s1054_s21 }
 0x197   : > { %p1057_p3 = pneg %p1056_p12 }
 0x198   : > { %p1063_p2 = por %p1062_p11, %p1061_p7 }
 0x19a   : > { %p1064_p8 = pnand %p1063_p2, %p1057_p3 }
 0x19c   : > { %1067 = shalt.err (!%p1064_p8)
}
 0x19d   : > { %s1068_s29 = scalar_lea.hbm %s1605_s17, 2048  ;;  %s1072_s30 = scalar_lea.hbm %s1691_s3, 4096 }
 0x19e   : > { %p1069_p10 = scmp.ne.s32.totalorder %s1605_s17, %s1068_s29  ;;  %p1073_p5 = scmp.lt.u32.totalorder %s1605_s17, %s1691_s3 }
 0x19f   : > { %p1074_p13 = scmp.lt.u32.totalorder %s1072_s30, %s1068_s29  ;;  %p1076_p6 = scmp.lt.u32.totalorder %s1068_s29, %s1605_s17 }
 0x1a0   : > { %p1070_p1 = pnand %p1069_p10, %p1728_p9 }
 0x1a1   : > { %p1075_p0 = por %p1074_p13, %p1073_p5 }
 0x1a2   : > { %p1071_p4 = pneg %p1070_p1 }
 0x1a3   : > { %p1077_p12 = por %p1076_p6, %p1075_p0 }
 0x1a5   : > { %p1078_p3 = pnand %p1077_p12, %p1071_p4 }
 0x1a7   : > { %1081 = shalt.err (!%p1078_p3)
}
 0x1a8   : > { %s1216_s26 = smov 256   ;;  %s1217_s0 = smov 16  }
 0x1a9   : > { %856 = dma.vmem_to_hbm [thread:$0]  (%p1728_p9), %s1608_s11, 2048, %s1605_s17, %s1612_s28, %s1216_s26, %s1216_s26, %s1217_s0  }
 0x1aa PF: > { %p870_p7 = scmp.ge.s32.totalorder %s1204_s25, 2  ;;  %s654_s9 = sand.u32 1, %s1152_s12  }
 0x1ab   : > { %p1729_p11 = scmp.ne.s32.totalorder %s1722_s7, 0  ;;  %s655_s18 = scalar_lea.sflag [#allocation5], %s654_s9 }
 0x1ad   : > { %p866_p2 = pnand %p870_p7, %p1729_p11 }
 0x1af   : > { %1147 = dma.done.wait (!%p866_p2), %s655_s18, 2048  }
 0x1b0   : > { %1149 = vsyncadd (!%p866_p2), %s655_s18, 4294965248  ;;  %s22_s25 = sadd.s32 1, %s1204_s25   ;;  %s1731_s10 = sld [smem:[#allocation18_spill]] }
 0x1b1   : > { %p1641_p8 = scmp.ge.s32.totalorder %s22_s25, 6   ;;  %s1732_s17 = sld [smem:[#allocation12_spill]] }
 0x1b2   : > { %s1733_s11 = sld [smem:[#allocation17_spill]]  ;;  %s1734_s28 = sld [smem:[#allocation13_spill]] }
 0x1b3   : > { %s1735_s20 = sld [smem:[#allocation16_spill]]  ;;  %s1736_s7 = sld [smem:[#allocation14_spill]] }
 0x1b4   : > { %s1737_s8 = sld [smem:[#allocation15_spill]]  ;;  %s1738_s12 = smov %s1156_s13 }
 0x1b5   : > { %s1739_s13 = smov %s1160_s14  ;;  %s1741_s15 = smov %s1168_s16 }
 0x1b6   : > { %s1740_s14 = smov %s1731_s10  ;;  %s1744_s18 = smov %s1180_s19 }
 0x1b7   : > { %s1742_s16 = smov %s1732_s17  ;;  %s1746_s21 = smov %s1196_s23 }
 0x1b8   : > { %s1743_s17 = smov %s1733_s11  ;;  %s1745_s19 = smov %s1734_s28 }
 0x1b9   : > { %s1747_s22 = smov %s1200_s24  ;;  %s1748_s23 = smov %s1736_s7 }
 0x1ba   : > { %s1749_s24 = smov %s1737_s8  ;;  %21 = sbr.rel (!%p1641_p8) target bundleno = 14 (0xe), region = 101 }
 0x1c1   :  { %660 = vsyncpa [#allocation4], 1 }
 0x1c2   :  { %662 = vsyncpa [#allocation4 + $0x1], 1 }
 0x1c3   :  { %663 = vsyncpa [#allocation7], 1 }
 0x1c4   :  { %665 = vsyncpa [#allocation7 + $0x1], 1 }
 0x1c5   :  { %666 = vsyncpa [#allocation5], 1 }
 0x1c6   :  { %668 = vsyncpa [#allocation5 + $0x1], 1 }

</bundles_post_ra>
